<compile_context>
chip_gen: v7x
topology: tpu7x:2x2x1
jax: 0.10.0
libtpu: 0.0.40
codegen_flags: <defaults>
</compile_context>

<pallas_src>
import functools

import jax
import jax.numpy as jnp
from jax import lax
from jax.experimental import pallas as pl
from jax.experimental.pallas import tpu as pltpu


def _round_up(x: int, m: int) -> int:
    return ((x + m - 1) // m) * m


def _round_down(x: int, m: int) -> int:
    return max(m, (x // m) * m)


def _fid_kernel(f1_ref, f2_ref, out_ref,
                sum1_ref, sq1_ref, sum2_ref, sq2_ref, ref0_1, ref0_2,
                *, n_rows, d_feat, tile_n, mask_rows):
    """Streams (tile_n, D) blocks of both feature matrices, accumulates shifted
    per-column sums / sums-of-squares into (8, D) f32 scratch, and finalizes
    mean / diag-covariance / trace on the last grid step."""
    step = pl.program_id(0)

    @pl.when(step == 0)
    def _init():
        sum1_ref[...] = jnp.zeros_like(sum1_ref)
        sq1_ref[...] = jnp.zeros_like(sq1_ref)
        sum2_ref[...] = jnp.zeros_like(sum2_ref)
        sq2_ref[...] = jnp.zeros_like(sq2_ref)
        # Shift point (row 0 of each input) for numerically stable single-pass
        # variance: Var(x) == Var(x - x0), and row 0 is always a valid row.
        ref0_1[...] = f1_ref[0:1, :].astype(jnp.float32)
        ref0_2[...] = f2_ref[0:1, :].astype(jnp.float32)

    # Upcast per vreg; HBM streams the native (possibly bf16) dtype.
    x1 = f1_ref[...].astype(jnp.float32) - ref0_1[...]
    x2 = f2_ref[...].astype(jnp.float32) - ref0_2[...]

    if mask_rows:  # static: only emitted when n_rows % tile_n != 0
        rows = lax.broadcasted_iota(jnp.int32, (tile_n, 1), 0) + step * tile_n
        valid = rows < n_rows
        x1 = jnp.where(valid, x1, 0.0)
        x2 = jnp.where(valid, x2, 0.0)

    # Hot loop: whole-vreg VPU adds only (no per-step cross-sublane collapse,
    # no masked single-row stores).
    g = tile_n // 8
    sum1_ref[...] += jnp.sum(x1.reshape(g, 8, d_feat), axis=0)
    sq1_ref[...] += jnp.sum((x1 * x1).reshape(g, 8, d_feat), axis=0)
    sum2_ref[...] += jnp.sum(x2.reshape(g, 8, d_feat), axis=0)
    sq2_ref[...] += jnp.sum((x2 * x2).reshape(g, 8, d_feat), axis=0)

    @pl.when(step == pl.num_programs(0) - 1)
    def _finalize():
        inv_n = jnp.float32(1.0 / n_rows)
        # Reference divides the covariance by (D-1) — the FEATURE dim. Keep it.
        inv_dm1 = jnp.float32(1.0 / (d_feat - 1))

        s1 = jnp.sum(sum1_ref[...], axis=0, keepdims=True)   # (1, D)
        s2 = jnp.sum(sum2_ref[...], axis=0, keepdims=True)
        q1 = jnp.sum(sq1_ref[...], axis=0, keepdims=True)
        q2 = jnp.sum(sq2_ref[...], axis=0, keepdims=True)

        mu1 = ref0_1[...] + s1 * inv_n                        # true means
        mu2 = ref0_2[...] + s2 * inv_n
        m = jnp.square(mu1 - mu2)

        # centered sum of squares of the shifted data (shift-invariant)
        css1 = q1 - s1 * (s1 * inv_n)
        css2 = q2 - s2 * (s2 * inv_n)
        diag1 = jnp.maximum(css1 * inv_dm1, 0.0)              # clamp fp noise
        diag2 = jnp.maximum(css2 * inv_dm1, 0.0)

        # trace(sigma1 + sigma2 - 2*sqrt(sigma1*sigma2)) touches diagonals only;
        # variances are >= 0 so the sqrt is NaN-free (matches the reference trace).
        tr = jnp.sum(diag1 + diag2 - 2.0 * jnp.sqrt(diag1 * diag2))
        out_ref[...] = m + tr                                 # (1, D)


def fid_pallas(fea1, fea2, *, tile_n=None):
    assert fea1.ndim == 2 and fea1.shape == fea2.shape
    n, d = fea1.shape
    assert n >= 1
    assert d >= 2, "reference divides by (D-1)"

    b1 = jnp.dtype(fea1.dtype).itemsize
    b2 = jnp.dtype(fea2.dtype).itemsize
    # Sublane alignment for the narrowest streamed dtype (f32:8, bf16:16, i8:32).
    row_align = 8 * max(1, 4 // min(b1, b2))
    d_lane = _round_up(d, 128)          # lane-padded footprint (VMEM accounting only)

    # Per-TensorCore VMEM budget with headroom below the physical capacity
    # (64 MiB on v7x, 128 MiB on v5e/v6e).
    try:
        vmem_cap = int(pltpu.get_tpu_info().vmem_capacity_bytes)
    except Exception:
        vmem_cap = 64 * 1024 * 1024
    vmem_cap = min(max(vmem_cap, 32 << 20), 128 << 20)
    fixed_vmem = 64 * d_lane * 4                       # accumulators + shift rows + out blocks
    input_budget = max(2 << 20, vmem_cap - (16 << 20) - fixed_vmem - (4 << 20))

    if tile_n is None:
        per_row_vmem = 2 * (b1 + b2) * d_lane          # both inputs, double-buffered
        tile_cap = _round_down(input_budget // per_row_vmem, row_align)
        # Target >= ~8 MiB of HBM traffic per grid step (amortizes per-step overhead).
        per_row_hbm = (b1 + b2) * d
        tile_target = _round_up(max(1, (8 << 20) // per_row_hbm), row_align)
        tile_target = min(max(tile_target, 1024), 8192)
        tile_n = min(tile_cap, tile_target, _round_up(n, row_align))
    tile_n = max(row_align, _round_down(int(tile_n), row_align))

    grid_steps = (n + tile_n - 1) // tile_n
    mask_rows = (n % tile_n) != 0

    in_vmem = 2 * tile_n * d_lane * (b1 + b2)          # 2 pipeline buffers per input
    vmem_limit = int(min(vmem_cap - (8 << 20),
                         max(8 << 20, in_vmem + fixed_vmem + (4 << 20))))

    cost = pl.CostEstimate(
        flops=8 * n * d,                               # shift/square/accumulate per elem
        transcendentals=2 * d,                         # sqrt in the finalize
        bytes_accessed=n * d * (b1 + b2) + d * 4,
    )

    kernel = functools.partial(_fid_kernel, n_rows=n, d_feat=d,
                               tile_n=tile_n, mask_rows=mask_rows)

    out = pl.pallas_call(
        kernel,
        out_shape=jax.ShapeDtypeStruct((1, d), jnp.float32),
        grid_spec=pltpu.PrefetchScalarGridSpec(
            num_scalar_prefetch=0,
            grid=(grid_steps,),
            in_specs=[
                pl.BlockSpec((tile_n, d), lambda i: (i, 0)),
                pl.BlockSpec((tile_n, d), lambda i: (i, 0)),
            ],
            out_specs=pl.BlockSpec((1, d), lambda i: (0, 0)),
            scratch_shapes=[pltpu.VMEM((8, d), jnp.float32)] * 4
                         + [pltpu.VMEM((1, d), jnp.float32)] * 2,
        ),
        compiler_params=pltpu.CompilerParams(
            dimension_semantics=("arbitrary",),        # reduction over N into scratch
            vmem_limit_bytes=vmem_limit,
        ),
        cost_estimate=cost,
    )(fea1, fea2)
    return out[0]                                      # (D,), f32 — matches PyTorch


def fid_reference(fea1, fea2):
    # Pure-JAX replication of the PyTorch module, kept for validation.
    def cov(f):
        mu = jnp.mean(f, axis=0, keepdims=True)
        x = f - mu
        return (x.T @ x) / (x.shape[1] - 1)
    mu1 = jnp.mean(fea1, axis=0)
    mu2 = jnp.mean(fea2, axis=0)
    m = jnp.square(mu1 - mu2)
    s1, s2 = cov(fea1), cov(fea2)
    s = jnp.sqrt(s1 * s2) * 2.0
    return m + jnp.trace(s1 + s2 - s)


if __name__ == "__main__":
    key = jax.random.PRNGKey(0)
    k1, k2 = jax.random.split(key)

    # Small shapes, deliberately unaligned to (8, 128) so the in-kernel row
    # masking path (no wrapper padding) is exercised.
    N, D = 50, 96
    fea1 = jax.random.normal(k1, (N, D), dtype=jnp.float32)
    fea2 = jax.random.normal(k2, (N, D), dtype=jnp.float32) * 1.3 + 0.2

    ref = fid_reference(fea1, fea2)

    # 1) default (auto) tiling: single grid step with a masked row remainder
    out = fid_pallas(fea1, fea2)
    jax.block_until_ready(out)
    assert out.shape == (D,), out.shape
    assert jnp.allclose(out, ref, rtol=1e-3, atol=1e-3), (out, ref)

    # 2) forced small tile: multiple grid steps + masked last tile (accumulator path)
    out2 = fid_pallas(fea1, fea2, tile_n=16)
    jax.block_until_ready(out2)
    assert jnp.allclose(out2, ref, rtol=1e-3, atol=1e-3), (out2, ref)

    # 3) bf16 streaming (half the HBM bytes), f32 accumulation inside the kernel
    f1b = fea1.astype(jnp.bfloat16)
    f2b = fea2.astype(jnp.bfloat16)
    out3 = fid_pallas(f1b, f2b)
    jax.block_until_ready(out3)
    ref3 = fid_reference(f1b.astype(jnp.float32), f2b.astype(jnp.float32))
    assert jnp.allclose(out3, ref3, rtol=5e-3, atol=5e-3), (out3, ref3)

    print("KERNEL_OK")
</pallas_src>

<mosaic_0001>
module attributes {stable_mosaic.version = 11 : i64} {
  func.func @_fid_kernel(%arg0: i32, %arg1: memref<56x96xf32, #tpu.memory_space<vmem>>, %arg2: memref<56x96xf32, #tpu.memory_space<vmem>>, %arg3: memref<1x96xf32, #tpu.memory_space<vmem>>, %arg4: memref<8x96xf32, #tpu.memory_space<vmem>>, %arg5: memref<8x96xf32, #tpu.memory_space<vmem>>, %arg6: memref<8x96xf32, #tpu.memory_space<vmem>>, %arg7: memref<8x96xf32, #tpu.memory_space<vmem>>, %arg8: memref<1x96xf32, #tpu.memory_space<vmem>>, %arg9: memref<1x96xf32, #tpu.memory_space<vmem>>) attributes {dimension_semantics = [#tpu.dimension_semantics<arbitrary>], iteration_bounds = array<i64: 1>, scalar_prefetch = 0 : i64, scratch_operands = 6 : i64, tpu.core_type = #tpu.core_type<tc>, window_params = [{transform_indices = @transform_0, window_bounds = array<i64: 56, 96>}, {transform_indices = @transform_1, window_bounds = array<i64: 56, 96>}, {pipeline_mode = #tpu.pipeline_mode<synchronous>, transform_indices = @transform_2, window_bounds = array<i64: 1, 96>}]} {
    %c0_i32 = arith.constant 0 : i32
    %0 = arith.cmpi eq, %arg0, %c0_i32 : i32
    %1 = arith.extui %0 : i1 to i32
    %c0_i32_0 = arith.constant 0 : i32
    %2 = arith.cmpi ne, %1, %c0_i32_0 : i32
    scf.if %2 {
      %cst_31 = arith.constant 0.000000e+00 : f32
      %50 = vector.broadcast %cst_31 : f32 to vector<8x96xf32>
      %c0_32 = arith.constant 0 : index
      %c0_33 = arith.constant 0 : index
      %51 = vector.load %arg4[%c0_32, %c0_33] : memref<8x96xf32, #tpu.memory_space<vmem>>, vector<8x96xf32>
      tpu.vector_store %arg4[%c0_32, %c0_33], %50 {strides = array<i32>} : memref<8x96xf32, #tpu.memory_space<vmem>>, vector<8x96xf32>,
      %cst_34 = arith.constant 0.000000e+00 : f32
      %52 = vector.broadcast %cst_34 : f32 to vector<8x96xf32>
      %c0_35 = arith.constant 0 : index
      %c0_36 = arith.constant 0 : index
      %53 = vector.load %arg5[%c0_35, %c0_36] : memref<8x96xf32, #tpu.memory_space<vmem>>, vector<8x96xf32>
      tpu.vector_store %arg5[%c0_35, %c0_36], %52 {strides = array<i32>} : memref<8x96xf32, #tpu.memory_space<vmem>>, vector<8x96xf32>,
      %cst_37 = arith.constant 0.000000e+00 : f32
      %54 = vector.broadcast %cst_37 : f32 to vector<8x96xf32>
      %c0_38 = arith.constant 0 : index
      %c0_39 = arith.constant 0 : index
      %55 = vector.load %arg6[%c0_38, %c0_39] : memref<8x96xf32, #tpu.memory_space<vmem>>, vector<8x96xf32>
      tpu.vector_store %arg6[%c0_38, %c0_39], %54 {strides = array<i32>} : memref<8x96xf32, #tpu.memory_space<vmem>>, vector<8x96xf32>,
      %cst_40 = arith.constant 0.000000e+00 : f32
      %56 = vector.broadcast %cst_40 : f32 to vector<8x96xf32>
      %c0_41 = arith.constant 0 : index
      %c0_42 = arith.constant 0 : index
      %57 = vector.load %arg7[%c0_41, %c0_42] : memref<8x96xf32, #tpu.memory_space<vmem>>, vector<8x96xf32>
      tpu.vector_store %arg7[%c0_41, %c0_42], %56 {strides = array<i32>} : memref<8x96xf32, #tpu.memory_space<vmem>>, vector<8x96xf32>,
      %c0_43 = arith.constant 0 : index
      %c0_44 = arith.constant 0 : index
      %58 = vector.load %arg1[%c0_43, %c0_44] : memref<56x96xf32, #tpu.memory_space<vmem>>, vector<1x96xf32>
      %c0_45 = arith.constant 0 : index
      %c0_46 = arith.constant 0 : index
      %59 = vector.load %arg8[%c0_45, %c0_46] : memref<1x96xf32, #tpu.memory_space<vmem>>, vector<1x96xf32>
      tpu.vector_store %arg8[%c0_45, %c0_46], %58 {strides = array<i32>} : memref<1x96xf32, #tpu.memory_space<vmem>>, vector<1x96xf32>,
      %c0_47 = arith.constant 0 : index
      %c0_48 = arith.constant 0 : index
      %60 = vector.load %arg2[%c0_47, %c0_48] : memref<56x96xf32, #tpu.memory_space<vmem>>, vector<1x96xf32>
      %c0_49 = arith.constant 0 : index
      %c0_50 = arith.constant 0 : index
      %61 = vector.load %arg9[%c0_49, %c0_50] : memref<1x96xf32, #tpu.memory_space<vmem>>, vector<1x96xf32>
      tpu.vector_store %arg9[%c0_49, %c0_50], %60 {strides = array<i32>} : memref<1x96xf32, #tpu.memory_space<vmem>>, vector<1x96xf32>,
    } else {
    }
    %c0 = arith.constant 0 : index
    %c0_1 = arith.constant 0 : index
    %3 = vector.load %arg1[%c0, %c0_1] : memref<56x96xf32, #tpu.memory_space<vmem>>, vector<56x96xf32>
    %c0_2 = arith.constant 0 : index
    %c0_3 = arith.constant 0 : index
    %4 = vector.load %arg8[%c0_2, %c0_3] : memref<1x96xf32, #tpu.memory_space<vmem>>, vector<1x96xf32>
    %5 = vector.broadcast %4 : vector<1x96xf32> to vector<56x96xf32>
    %6 = arith.subf %3, %5 : vector<56x96xf32>
    %c0_4 = arith.constant 0 : index
    %c0_5 = arith.constant 0 : index
    %7 = vector.load %arg2[%c0_4, %c0_5] : memref<56x96xf32, #tpu.memory_space<vmem>>, vector<56x96xf32>
    %c0_6 = arith.constant 0 : index
    %c0_7 = arith.constant 0 : index
    %8 = vector.load %arg9[%c0_6, %c0_7] : memref<1x96xf32, #tpu.memory_space<vmem>>, vector<1x96xf32>
    %9 = vector.broadcast %8 : vector<1x96xf32> to vector<56x96xf32>
    %10 = arith.subf %7, %9 : vector<56x96xf32>
    %11 = tpu.iota {dimensions = array<i32: 0>} : vector<56x1xi32>
    %c56_i32 = arith.constant 56 : i32
    %12 = arith.muli %arg0, %c56_i32 : i32
    %13 = vector.broadcast %12 : i32 to vector<56x1xi32>
    %14 = arith.addi %11, %13 : vector<56x1xi32>
    %c50_i32 = arith.constant 50 : i32
    %15 = vector.broadcast %c50_i32 : i32 to vector<56x1xi32>
    %16 = arith.cmpi slt, %14, %15 : vector<56x1xi32>
    %cst = arith.constant 0.000000e+00 : f32
    %17 = vector.shape_cast %16 : vector<56x1xi1> to vector<56x1xi1>
    %18 = vector.broadcast %17 : vector<56x1xi1> to vector<56x96xi1>
    %19 = vector.broadcast %cst : f32 to vector<56x96xf32>
    %20 = arith.select %18, %6, %19 : vector<56x96xi1>, vector<56x96xf32>
    %cst_8 = arith.constant 0.000000e+00 : f32
    %21 = vector.shape_cast %16 : vector<56x1xi1> to vector<56x1xi1>
    %22 = vector.broadcast %21 : vector<56x1xi1> to vector<56x96xi1>
    %23 = vector.broadcast %cst_8 : f32 to vector<56x96xf32>
    %24 = arith.select %22, %10, %23 : vector<56x96xi1>, vector<56x96xf32>
    %c0_9 = arith.constant 0 : index
    %c0_10 = arith.constant 0 : index
    %25 = vector.load %arg4[%c0_9, %c0_10] : memref<8x96xf32, #tpu.memory_space<vmem>>, vector<8x96xf32>
    %26 = vector.shape_cast %20 : vector<56x96xf32> to vector<7x8x96xf32>
    %cst_11 = arith.constant dense<0.000000e+00> : vector<8x96xf32>
    %27 = vector.multi_reduction <add>, %26, %cst_11 [0] : vector<7x8x96xf32> to vector<8x96xf32>
    %28 = arith.addf %25, %27 : vector<8x96xf32>
    %c0_12 = arith.constant 0 : index
    %c0_13 = arith.constant 0 : index
    %29 = vector.load %arg4[%c0_12, %c0_13] : memref<8x96xf32, #tpu.memory_space<vmem>>, vector<8x96xf32>
    tpu.vector_store %arg4[%c0_12, %c0_13], %28 {strides = array<i32>} : memref<8x96xf32, #tpu.memory_space<vmem>>, vector<8x96xf32>,
    %c0_14 = arith.constant 0 : index
    %c0_15 = arith.constant 0 : index
    %30 = vector.load %arg5[%c0_14, %c0_15] : memref<8x96xf32, #tpu.memory_space<vmem>>, vector<8x96xf32>
    %31 = arith.mulf %20, %20 : vector<56x96xf32>
    %32 = vector.shape_cast %31 : vector<56x96xf32> to vector<7x8x96xf32>
    %cst_16 = arith.constant dense<0.000000e+00> : vector<8x96xf32>
    %33 = vector.multi_reduction <add>, %32, %cst_16 [0] : vector<7x8x96xf32> to vector<8x96xf32>
    %34 = arith.addf %30, %33 : vector<8x96xf32>
    %c0_17 = arith.constant 0 : index
    %c0_18 = arith.constant 0 : index
    %35 = vector.load %arg5[%c0_17, %c0_18] : memref<8x96xf32, #tpu.memory_space<vmem>>, vector<8x96xf32>
    tpu.vector_store %arg5[%c0_17, %c0_18], %34 {strides = array<i32>} : memref<8x96xf32, #tpu.memory_space<vmem>>, vector<8x96xf32>,
    %c0_19 = arith.constant 0 : index
    %c0_20 = arith.constant 0 : index
    %36 = vector.load %arg6[%c0_19, %c0_20] : memref<8x96xf32, #tpu.memory_space<vmem>>, vector<8x96xf32>
    %37 = vector.shape_cast %24 : vector<56x96xf32> to vector<7x8x96xf32>
    %cst_21 = arith.constant dense<0.000000e+00> : vector<8x96xf32>
    %38 = vector.multi_reduction <add>, %37, %cst_21 [0] : vector<7x8x96xf32> to vector<8x96xf32>
    %39 = arith.addf %36, %38 : vector<8x96xf32>
    %c0_22 = arith.constant 0 : index
    %c0_23 = arith.constant 0 : index
    %40 = vector.load %arg6[%c0_22, %c0_23] : memref<8x96xf32, #tpu.memory_space<vmem>>, vector<8x96xf32>
    tpu.vector_store %arg6[%c0_22, %c0_23], %39 {strides = array<i32>} : memref<8x96xf32, #tpu.memory_space<vmem>>, vector<8x96xf32>,
    %c0_24 = arith.constant 0 : index
    %c0_25 = arith.constant 0 : index
    %41 = vector.load %arg7[%c0_24, %c0_25] : memref<8x96xf32, #tpu.memory_space<vmem>>, vector<8x96xf32>
    %42 = arith.mulf %24, %24 : vector<56x96xf32>
    %43 = vector.shape_cast %42 : vector<56x96xf32> to vector<7x8x96xf32>
    %cst_26 = arith.constant dense<0.000000e+00> : vector<8x96xf32>
    %44 = vector.multi_reduction <add>, %43, %cst_26 [0] : vector<7x8x96xf32> to vector<8x96xf32>
    %45 = arith.addf %41, %44 : vector<8x96xf32>
    %c0_27 = arith.constant 0 : index
    %c0_28 = arith.constant 0 : index
    %46 = vector.load %arg7[%c0_27, %c0_28] : memref<8x96xf32, #tpu.memory_space<vmem>>, vector<8x96xf32>
    tpu.vector_store %arg7[%c0_27, %c0_28], %45 {strides = array<i32>} : memref<8x96xf32, #tpu.memory_space<vmem>>, vector<8x96xf32>,
    %c0_i32_29 = arith.constant 0 : i32
    %47 = arith.cmpi eq, %arg0, %c0_i32_29 : i32
    %48 = arith.extui %47 : i1 to i32
    %c0_i32_30 = arith.constant 0 : i32
    %49 = arith.cmpi ne, %48, %c0_i32_30 : i32
    scf.if %49 {
      %c0_31 = arith.constant 0 : index
      %c0_32 = arith.constant 0 : index
      %50 = vector.load %arg4[%c0_31, %c0_32] : memref<8x96xf32, #tpu.memory_space<vmem>>, vector<8x96xf32>
      %cst_33 = arith.constant dense<0.000000e+00> : vector<96xf32>
      %51 = vector.multi_reduction <add>, %50, %cst_33 [0] : vector<8x96xf32> to vector<96xf32>
      %52 = vector.shape_cast %51 : vector<96xf32> to vector<1x96xf32>
      %c0_34 = arith.constant 0 : index
      %c0_35 = arith.constant 0 : index
      %53 = vector.load %arg6[%c0_34, %c0_35] : memref<8x96xf32, #tpu.memory_space<vmem>>, vector<8x96xf32>
      %cst_36 = arith.constant dense<0.000000e+00> : vector<96xf32>
      %54 = vector.multi_reduction <add>, %53, %cst_36 [0] : vector<8x96xf32> to vector<96xf32>
      %55 = vector.shape_cast %54 : vector<96xf32> to vector<1x96xf32>
      %c0_37 = arith.constant 0 : index
      %c0_38 = arith.constant 0 : index
      %56 = vector.load %arg5[%c0_37, %c0_38] : memref<8x96xf32, #tpu.memory_space<vmem>>, vector<8x96xf32>
      %cst_39 = arith.constant dense<0.000000e+00> : vector<96xf32>
      %57 = vector.multi_reduction <add>, %56, %cst_39 [0] : vector<8x96xf32> to vector<96xf32>
      %58 = vector.shape_cast %57 : vector<96xf32> to vector<1x96xf32>
      %c0_40 = arith.constant 0 : index
      %c0_41 = arith.constant 0 : index
      %59 = vector.load %arg7[%c0_40, %c0_41] : memref<8x96xf32, #tpu.memory_space<vmem>>, vector<8x96xf32>
      %cst_42 = arith.constant dense<0.000000e+00> : vector<96xf32>
      %60 = vector.multi_reduction <add>, %59, %cst_42 [0] : vector<8x96xf32> to vector<96xf32>
      %61 = vector.shape_cast %60 : vector<96xf32> to vector<1x96xf32>
      %c0_43 = arith.constant 0 : index
      %c0_44 = arith.constant 0 : index
      %62 = vector.load %arg8[%c0_43, %c0_44] : memref<1x96xf32, #tpu.memory_space<vmem>>, vector<1x96xf32>
      %cst_45 = arith.constant 2.000000e-02 : f32
      %63 = vector.broadcast %cst_45 : f32 to vector<1x96xf32>
      %64 = arith.mulf %52, %63 : vector<1x96xf32>
      %65 = arith.addf %62, %64 : vector<1x96xf32>
      %c0_46 = arith.constant 0 : index
      %c0_47 = arith.constant 0 : index
      %66 = vector.load %arg9[%c0_46, %c0_47] : memref<1x96xf32, #tpu.memory_space<vmem>>, vector<1x96xf32>
      %cst_48 = arith.constant 2.000000e-02 : f32
      %67 = vector.broadcast %cst_48 : f32 to vector<1x96xf32>
      %68 = arith.mulf %55, %67 : vector<1x96xf32>
      %69 = arith.addf %66, %68 : vector<1x96xf32>
      %70 = arith.subf %65, %69 : vector<1x96xf32>
      %71 = arith.mulf %70, %70 : vector<1x96xf32>
      %cst_49 = arith.constant 2.000000e-02 : f32
      %72 = vector.broadcast %cst_49 : f32 to vector<1x96xf32>
      %73 = arith.mulf %52, %72 : vector<1x96xf32>
      %74 = arith.mulf %52, %73 : vector<1x96xf32>
      %75 = arith.subf %58, %74 : vector<1x96xf32>
      %cst_50 = arith.constant 2.000000e-02 : f32
      %76 = vector.broadcast %cst_50 : f32 to vector<1x96xf32>
      %77 = arith.mulf %55, %76 : vector<1x96xf32>
      %78 = arith.mulf %55, %77 : vector<1x96xf32>
      %79 = arith.subf %61, %78 : vector<1x96xf32>
      %cst_51 = arith.constant 0.0105263162 : f32
      %80 = vector.broadcast %cst_51 : f32 to vector<1x96xf32>
      %81 = arith.mulf %75, %80 : vector<1x96xf32>
      %cst_52 = arith.constant 0.000000e+00 : f32
      %82 = vector.broadcast %cst_52 : f32 to vector<1x96xf32>
      %83 = arith.maximumf %81, %82 : vector<1x96xf32>
      %cst_53 = arith.constant 0.0105263162 : f32
      %84 = vector.broadcast %cst_53 : f32 to vector<1x96xf32>
      %85 = arith.mulf %79, %84 : vector<1x96xf32>
      %cst_54 = arith.constant 0.000000e+00 : f32
      %86 = vector.broadcast %cst_54 : f32 to vector<1x96xf32>
      %87 = arith.maximumf %85, %86 : vector<1x96xf32>
      %88 = arith.addf %83, %87 : vector<1x96xf32>
      %89 = arith.mulf %83, %87 : vector<1x96xf32>
      %90 = math.sqrt %89 : vector<1x96xf32>
      %cst_55 = arith.constant 2.000000e+00 : f32
      %91 = vector.broadcast %cst_55 : f32 to vector<1x96xf32>
      %92 = arith.mulf %91, %90 : vector<1x96xf32>
      %93 = arith.subf %88, %92 : vector<1x96xf32>
      %94 = vector.shape_cast %93 : vector<1x96xf32> to vector<1x1x96xf32>
      %cst_56 = arith.constant dense<0.000000e+00> : vector<1xf32>
      %95 = vector.multi_reduction <add>, %94, %cst_56 [1, 2] : vector<1x1x96xf32> to vector<1xf32>
      %96 = vector.shape_cast %95 : vector<1xf32> to vector<1x1x1xf32>
      %97 = vector.extract %96[0, 0, 0] : f32 from vector<1x1x1xf32>
      %98 = vector.broadcast %97 : f32 to vector<1x96xf32>
      %99 = arith.addf %71, %98 : vector<1x96xf32>
      %c0_57 = arith.constant 0 : index
      %c0_58 = arith.constant 0 : index
      %100 = vector.load %arg3[%c0_57, %c0_58] : memref<1x96xf32, #tpu.memory_space<vmem>>, vector<1x96xf32>
      tpu.vector_store %arg3[%c0_57, %c0_58], %99 {strides = array<i32>} : memref<1x96xf32, #tpu.memory_space<vmem>>, vector<1x96xf32>,
    } else {
    }
    return
  }
  func.func @transform_0(%arg0: i32) -> (i32, i32) {
    %c0_i32 = arith.constant 0 : i32
    %c0_i32_0 = arith.constant 0 : i32
    return %arg0, %c0_i32 : i32, i32
  }
  func.func @transform_1(%arg0: i32) -> (i32, i32) {
    %c0_i32 = arith.constant 0 : i32
    %c0_i32_0 = arith.constant 0 : i32
    return %arg0, %c0_i32 : i32, i32
  }
  func.func @transform_2(%arg0: i32) -> (i32, i32) {
    %c0_i32 = arith.constant 0 : i32
    %c0_i32_0 = arith.constant 0 : i32
    %c0_i32_1 = arith.constant 0 : i32
    return %c0_i32, %c0_i32_0 : i32, i32
  }
}

</mosaic_0001>

<bundles_post_ra>
// kernel: tpu_custom_call.1
= control target key start
LH: loop header
LB: loop body
LE: loop exit
PB: predicated region body
PF: predicated region fallthrough
CT: control target
= control target key end

     0   :  { %7 = vsyncpa [#allocation9], 0  ;;  %s506_s0 = inlined_call_operand.hbm [shape: f32[50,96], index: 0, kind: input, shape index: {}]   ;;  %s507_s1 = inlined_call_operand.hbm [shape: f32[50,96], index: 1, kind: input, shape index: {}]   ;;  %s508_s2 = inlined_call_operand.hbm [shape: f32[1,96], index: 2, kind: output, shape index: {}]  }
   0x1   :  { %8 = vsyncpa [#allocation12], 0 }
   0x2   :  { %9 = vsyncpa [#allocation10], 0  ;;  %s403_s9 = smov [#allocation8]   ;;  %s331_s13 = scalar_lea.hbm %s506_s0, 896 }
   0x3   :  { %s15_s10 = sshll.u32 %s403_s9, 4  ;;  %p332_p0 = scmp.ne.s32.totalorder %s506_s0, %s331_s13  ;;  %s16_s10 = int_to_ptr.vmem [resolvable:$true] %s15_s10 }
   0x4   :  { %p335_p1 = scmp.lt.u32.totalorder %s331_s13, %s506_s0 }
   0x6   :  { %p337_p2 = pnand %p335_p1, %p332_p0 }
   0x8   :  { %340 = shalt.err (!%p337_p2)
}
   0x9   :  { %s341_s18 = scalar_lea.vmem %s16_s10, 896  ;;  %p346_p4 = scmp.lt.s32.totalorder %s16_s10, %s16_s10 }
   0xa   :  { %p342_p3 = scmp.ne.s32.totalorder %s16_s10, %s341_s18  ;;  %p347_p5 = scmp.lt.s32.totalorder %s341_s18, %s341_s18 }
   0xc   :  { %p348_p6 = por %p347_p5, %p346_p4 }
   0xe   :  { %p349_p7 = pnand %p348_p6, %p342_p3 }
  0x10   :  { %352 = shalt.err (!%p349_p7)
}
  0x11   :  { %s404_s19 = smov 128   ;;  %s405_s20 = smov 8  }
  0x12   :  { %21 = dma.hbm_to_vmem [thread:$0]  %s506_s0, 896, %s16_s10, [#allocation9], %s404_s19, %s404_s19, %s405_s20  }
  0x13   :  { %s406_s23 = smov [#allocation11]   ;;  %s353_s27 = scalar_lea.hbm %s507_s1, 896 }
  0x14   :  { %s27_s24 = sshll.u32 %s406_s23, 4  ;;  %p354_p8 = scmp.ne.s32.totalorder %s507_s1, %s353_s27  ;;  %s28_s24 = int_to_ptr.vmem [resolvable:$true] %s27_s24 }
  0x15   :  { %p357_p9 = scmp.lt.u32.totalorder %s353_s27, %s507_s1 }
  0x17   :  { %p359_p10 = pnand %p357_p9, %p354_p8 }
  0x19   :  { %362 = shalt.err (!%p359_p10)
}
  0x1a   :  { %s363_s4 = scalar_lea.vmem %s28_s24, 896  ;;  %p368_p12 = scmp.lt.s32.totalorder %s28_s24, %s28_s24 }
  0x1b   :  { %p364_p11 = scmp.ne.s32.totalorder %s28_s24, %s363_s4  ;;  %p369_p13 = scmp.lt.s32.totalorder %s363_s4, %s363_s4 }
  0x1d   :  { %p370_p0 = por %p369_p13, %p368_p12 }
  0x1f   :  { %p371_p1 = pnand %p370_p0, %p364_p11 }
  0x21   :  { %374 = shalt.err (!%p371_p1)
}
  0x22   :  { %33 = dma.hbm_to_vmem [thread:$0]  %s507_s1, 896, %s28_s24, [#allocation12], %s404_s19, %s404_s19, %s405_s20  }
  0x23   :  { %397 = dma.done.wait [#allocation9], 896  }
  0x24   :  { %398 = vsyncadd [#allocation9], 4294966400 }
  0x25   :  { %399 = dma.done.wait [#allocation12], 896  }
  0x26   :  { %400 = vsyncadd [#allocation12], 4294966400  ;;  %vm44_vm0 = vcmask 785408   ;;  %v407_v0 = vmov 0.0   ;;  %vm50_vm1 = vcmask 778240   ;;  %v96_v1 = vlaneseq  ;;  %v54_v5 = vld [vmem:[#allocation8] sm:$0xff] }
  0x27   :  { %45 = vst.msk [vmem:[#allocation2] sm:$0xff] %vm44_vm0, %v407_v0  ;;  %46 = vst.msk [vmem:[#allocation3] sm:$0xff] %vm44_vm0, %v407_v0  ;;  %v49_v2 = vld [vmem:[#allocation8] sm:$0x1]  ;;  %v52_v3 = vld [vmem:[#allocation11] sm:$0x1] }
  0x28   :  { %47 = vst.msk [vmem:[#allocation4] sm:$0xff] %vm44_vm0, %v407_v0  ;;  %48 = vst.msk [vmem:[#allocation5] sm:$0xff] %vm44_vm0, %v407_v0  ;;  %v97_v4 = vshrl.u32 %v96_v1, 7  ;;  %v55_v6 = vld [vmem:[#allocation8 + $0x8] sm:$0xff]  ;;  %v56_v7 = vld [vmem:[#allocation8 + $0x10] sm:$0xff]  ;;  %s408_s1 = smov [#allocation13]  }
  0x29   :  { %51 = vst.msk [vmem:[#allocation6] sm:$0x1] %vm50_vm1, %v49_v2  ;;  %53 = vst.msk [vmem:[#allocation7] sm:$0x1] %vm50_vm1, %v52_v3  ;;  %v57_v8 = vld [vmem:[#allocation8 + $0x18] sm:$0xff]  ;;  %v58_v9 = vld [vmem:[#allocation8 + $0x20] sm:$0xff] }
  0x2a   :  { %v59_v10 = vld [vmem:[#allocation8 + $0x28] sm:$0xff]  ;;  %v60_v11 = vld [vmem:[#allocation8 + $0x30] sm:$0xff]  ;;  %v103_v12 = vadd.s32 48, %v97_v4  ;;  %v75_v14 = vld [vmem:[#allocation11] sm:$0xff]  ;;  %s309_s6 = sshll.u32 %s408_s1, 4  ;;  %s310_s6 = int_to_ptr.vmem [resolvable:$true] %s309_s6 }
  0x2b   :  { %v76_v19 = vld [vmem:[#allocation11 + $0x8] sm:$0xff]  ;;  %v77_v20 = vld [vmem:[#allocation11 + $0x10] sm:$0xff]  ;;  %v78_v24 = vld [vmem:[#allocation11 + $0x18] sm:$0xff]  ;;  %s375_s8 = scalar_lea.vmem %s310_s6, 16  ;;  %s379_s9 = scalar_lea.vmem %s310_s6, 32 }
  0x2c   :  { %v81_v21 = vld [vmem:[#allocation11 + $0x30] sm:$0xff]  ;;  %v79_v25 = vld [vmem:[#allocation11 + $0x20] sm:$0xff]  ;;  %v80_v28 = vld [vmem:[#allocation11 + $0x28] sm:$0xff]  ;;  %vm119_vm2 = vcmp.lt.s32.totalorder %v103_v12, 50  ;;  %p376_p2 = scmp.ne.s32.totalorder %s310_s6, %s375_s8  ;;  %p380_p3 = scmp.lt.s32.totalorder %s310_s6, %s310_s6 }
  0x2d   :  { %p381_p4 = scmp.lt.s32.totalorder %s379_s9, %s375_s8 }
  0x2f   :  { %p382_p5 = por %p381_p4, %p380_p3 }
  0x30   :  { %v319_v13 = vld [vmem:[#allocation6] ss:$0 sm:$0xff]  ;;  %v320_v15 = vld [vmem:[#allocation7] ss:$0 sm:$0xff] }
  0x31   :  { %v68_v16 = vsub.f32 %v54_v5, %v319_v13  ;;  %v69_v17 = vsub.f32 %v55_v6, %v319_v13  ;;  %v70_v18 = vsub.f32 %v56_v7, %v319_v13  ;;  %v71_v22 = vsub.f32 %v57_v8, %v319_v13  ;;  %p383_p6 = pnand %p382_p5, %p376_p2 }
  0x32   :  { %v74_v23 = vsub.f32 %v60_v11, %v319_v13  ;;  %v72_v26 = vsub.f32 %v58_v9, %v319_v13  ;;  %v73_v27 = vsub.f32 %v59_v10, %v319_v13  ;;  %v89_v29 = vsub.f32 %v75_v14, %v320_v15  ;;  %v148_v10 = vld [vmem:[#allocation2] sm:$0xff] }
  0x33   :  { %v90_v30 = vsub.f32 %v76_v19, %v320_v15  ;;  %v91_v31 = vsub.f32 %v77_v20, %v320_v15  ;;  %v95_v32 = vsub.f32 %v81_v21, %v320_v15  ;;  %v150_v33 = vsel %vm44_vm0, %v68_v16, 0.0 }
  0x34   :  { %v92_v34 = vsub.f32 %v78_v24, %v320_v15  ;;  %v93_v35 = vsub.f32 %v79_v25, %v320_v15  ;;  %v151_v36 = vsel %vm44_vm0, %v69_v17, 0.0  ;;  %v153_v37 = vsel %vm44_vm0, %v70_v18, 0.0 }
  0x35   :  { %v94_v38 = vsub.f32 %v80_v28, %v320_v15  ;;  %v140_v39 = vsel %vm119_vm2, %v74_v23, 0.0  ;;  %v152_v40 = vadd.f32 %v151_v36, %v150_v33  ;;  %v155_v41 = vsel %vm44_vm0, %v71_v22, 0.0 }
  0x36   :  { %v166_v42 = vmul.f32 %v68_v16, %v68_v16  ;;  %v167_v43 = vmul.f32 %v69_v17, %v69_v17  ;;  %v168_v44 = vmul.f32 %v70_v18, %v70_v18  ;;  %v169_v45 = vmul.f32 %v71_v22, %v71_v22 }
  0x37   :  { %v147_v46 = vsel %vm119_vm2, %v95_v32, 0.0  ;;  %v154_v47 = vadd.f32 %v153_v37, %v152_v40  ;;  %v157_v48 = vsel %vm44_vm0, %v72_v26, 0.0  ;;  %v170_v49 = vmul.f32 %v72_v26, %v72_v26 }
  0x38   :  { %v171_v50 = vmul.f32 %v73_v27, %v73_v27  ;;  %v173_v51 = vsel %vm44_vm0, %v166_v42, 0.0  ;;  %v174_v52 = vsel %vm44_vm0, %v167_v43, 0.0  ;;  %v176_v53 = vsel %vm44_vm0, %v168_v44, 0.0 }
  0x39   :  { %v156_v54 = vadd.f32 %v155_v41, %v154_v47  ;;  %v159_v55 = vsel %vm44_vm0, %v73_v27, 0.0  ;;  %v172_v56 = vmul.f32 %v140_v39, %v140_v39  ;;  %v175_v57 = vadd.f32 %v174_v52, %v173_v51  ;;  %v165_v27 = vld [vmem:[#allocation3] sm:$0xff] }
  0x3a   :  { %v178_v58 = vsel %vm44_vm0, %v169_v45, 0.0  ;;  %v189_v59 = vsel %vm44_vm0, %v89_v29, 0.0  ;;  %v190_v60 = vsel %vm44_vm0, %v90_v30, 0.0  ;;  %v192_v61 = vsel %vm44_vm0, %v91_v31, 0.0  ;;  %v204_v45 = vld [vmem:[#allocation5] sm:$0xff] }
  0x3b   :  { %v158_v62 = vadd.f32 %v157_v48, %v156_v54  ;;  %v161_v63 = vsel %vm44_vm0, %v140_v39, 0.0  ;;  %v177_v0 = vadd.f32 %v176_v53, %v175_v57  ;;  %v191_v1 = vadd.f32 %v190_v60, %v189_v59 }
  0x3c   :  { %v180_v2 = vsel %vm44_vm0, %v170_v49, 0.0  ;;  %v182_v3 = vsel %vm44_vm0, %v171_v50, 0.0  ;;  %v194_v4 = vsel %vm44_vm0, %v92_v34, 0.0  ;;  %v205_v5 = vmul.f32 %v89_v29, %v89_v29 }
  0x3d   :  { %v160_v6 = vadd.f32 %v159_v55, %v158_v62  ;;  %v179_v7 = vadd.f32 %v178_v58, %v177_v0  ;;  %v193_v8 = vadd.f32 %v192_v61, %v191_v1  ;;  %v206_v9 = vmul.f32 %v90_v30, %v90_v30 }
  0x3e   :  { %v184_v11 = vsel %vm44_vm0, %v172_v56, 0.0  ;;  %v196_v12 = vsel %vm44_vm0, %v93_v35, 0.0  ;;  %v207_v13 = vmul.f32 %v91_v31, %v91_v31  ;;  %v208_v14 = vmul.f32 %v92_v34, %v92_v34  ;;  %v188_v34 = vld [vmem:[#allocation4] sm:$0xff] }
  0x3f   :  { %v162_v15 = vadd.f32 %v161_v63, %v160_v6  ;;  %v181_v16 = vadd.f32 %v180_v2, %v179_v7  ;;  %v195_v17 = vadd.f32 %v194_v4, %v193_v8  ;;  %v198_v18 = vsel %vm44_vm0, %v94_v38, 0.0 }
  0x40   :  { %v209_v19 = vmul.f32 %v93_v35, %v93_v35  ;;  %v212_v20 = vsel %vm44_vm0, %v205_v5, 0.0  ;;  %v213_v21 = vsel %vm44_vm0, %v206_v9, 0.0  ;;  %v215_v22 = vsel %vm44_vm0, %v207_v13, 0.0 }
  0x41   :  { %v163_v23 = vadd.f32 %v162_v15, %v148_v10  ;;  %v183_v24 = vadd.f32 %v182_v3, %v181_v16  ;;  %v197_v25 = vadd.f32 %v196_v12, %v195_v17  ;;  %v214_v26 = vadd.f32 %v213_v21, %v212_v20 }
  0x42   :  { %v200_v28 = vsel %vm44_vm0, %v147_v46, 0.0  ;;  %v210_v29 = vmul.f32 %v94_v38, %v94_v38  ;;  %v217_v30 = vsel %vm44_vm0, %v208_v14, 0.0  ;;  %v211_v35 = vmul.f32 %v147_v46, %v147_v46 }
  0x43   :  { %164 = vst.msk [vmem:[#allocation2] sm:$0xff] %vm44_vm0, %v163_v23  ;;  %v185_v31 = vadd.f32 %v184_v11, %v183_v24  ;;  %v199_v32 = vadd.f32 %v198_v18, %v197_v25  ;;  %v216_v33 = vadd.f32 %v215_v22, %v214_v26  ;;  %v219_v36 = vsel %vm44_vm0, %v209_v19, 0.0 }
  0x44   :  { %v221_v41 = vsel %vm44_vm0, %v210_v29, 0.0  ;;  %v223_v43 = vsel %vm44_vm0, %v211_v35, 0.0 }
  0x45   :  { %v186_v37 = vadd.f32 %v185_v31, %v165_v27  ;;  %v201_v39 = vadd.f32 %v200_v28, %v199_v32  ;;  %v218_v40 = vadd.f32 %v217_v30, %v216_v33 }
  0x47   :  { %187 = vst.msk [vmem:[#allocation3] sm:$0xff] %vm44_vm0, %v186_v37  ;;  %v202_v42 = vadd.f32 %v201_v39, %v188_v34  ;;  %v220_v38 = vadd.f32 %v219_v36, %v218_v40 }
  0x49   :  { %203 = vst.msk [vmem:[#allocation4] sm:$0xff] %vm44_vm0, %v202_v42  ;;  %v222_v44 = vadd.f32 %v221_v41, %v220_v38 }
  0x4a   :  { %v230_v47 = vld [vmem:[#allocation2] sm:$0xff] }
  0x4b   :  { %v224_v48 = vadd.f32 %v223_v43, %v222_v44  ;;  %v231_v46 = vsel %vm44_vm0, %v230_v47, 0.0  ;;  %v262_v43 = vld [vmem:[#allocation6] sm:$0x1]  ;;  %v265_v44 = vld [vmem:[#allocation7] sm:$0x1] }
  0x4c   :  { %v232_v49 = vrot.slane %v231_v46, 4 }
  0x4d   :  { %v225_v50 = vadd.f32 %v224_v48, %v204_v45 }
  0x4e   :  { %v233_v51 = vadd.f32 %v232_v49, %v231_v46  ;;  %v246_v52 = vld [vmem:[#allocation3] sm:$0xff] }
  0x4f   :  { %226 = vst.msk [vmem:[#allocation5] sm:$0xff] %vm44_vm0, %v225_v50  ;;  %v247_v53 = vsel %vm44_vm0, %v246_v52, 0.0 }
  0x50   :  { %v234_v54 = vrot.slane %v233_v51, 2  ;;  %v238_v55 = vld [vmem:[#allocation4] sm:$0xff]  ;;  %v248_v56 = vrot.slane %v247_v53, 4 }
  0x51   :  { %v239_v57 = vsel %vm44_vm0, %v238_v55, 0.0 }
  0x52   :  { %v235_v58 = vadd.f32 %v234_v54, %v233_v51  ;;  %v240_v59 = vrot.slane %v239_v57, 4  ;;  %v249_v60 = vadd.f32 %v248_v56, %v247_v53 }
  0x54   :  { %v236_v61 = vrot.slane %v235_v58, 1  ;;  %v241_v62 = vadd.f32 %v240_v59, %v239_v57  ;;  %v250_v63 = vrot.slane %v249_v60, 2 }
  0x56   :  { %v237_v0 = vadd.f32 %v236_v61, %v235_v58  ;;  %v242_v1 = vrot.slane %v241_v62, 2  ;;  %v251_v2 = vadd.f32 %v250_v63, %v249_v60  ;;  %v254_v3 = vld [vmem:[#allocation5] sm:$0xff] }
  0x57   :  { %v255_v4 = vsel %vm44_vm0, %v254_v3, 0.0 }
  0x58   :  { %v243_v5 = vadd.f32 %v242_v1, %v241_v62  ;;  %v252_v6 = vrot.slane %v251_v2, 1  ;;  %v256_v7 = vrot.slane %v255_v4, 4  ;;  %v263_v8 = vmul.f32 0.02, %v237_v0 }
  0x5a   :  { %v244_v9 = vrot.slane %v243_v5, 1  ;;  %v253_v10 = vadd.f32 %v252_v6, %v251_v2  ;;  %v257_v11 = vadd.f32 %v256_v7, %v255_v4  ;;  %v270_v12 = vmul.f32 %v263_v8, %v237_v0 }
  0x5b   :  { %v264_v45 = vadd.f32 %v263_v8, %v262_v43 }
  0x5c   :  { %v245_v13 = vadd.f32 %v244_v9, %v243_v5  ;;  %v258_v14 = vrot.slane %v257_v11, 2  ;;  %v271_v17 = vsub.f32 %v253_v10, %v270_v12 }
  0x5e   :  { %v259_v15 = vadd.f32 %v258_v14, %v257_v11  ;;  %v266_v16 = vmul.f32 0.02, %v245_v13  ;;  %v274_v21 = vmul.f32 0.010526316, %v271_v17 }
  0x60   :  { %v260_v18 = vrot.slane %v259_v15, 1  ;;  %v272_v19 = vmul.f32 %v266_v16, %v245_v13  ;;  %v275_v23 = vmax.f32 %v274_v21, 0.0  ;;  %v267_v47 = vadd.f32 %v266_v16, %v265_v44 }
  0x62   :  { %v261_v20 = vadd.f32 %v260_v18, %v259_v15  ;;  %v268_v48 = vsub.f32 %v264_v45, %v267_v47 }
  0x64   :  { %v273_v22 = vsub.f32 %v261_v20, %v272_v19  ;;  %v269_v46 = vmul.f32 %v268_v48, %v268_v48 }
  0x66   :  { %v276_v24 = vmul.f32 0.010526316, %v273_v22 }
  0x68   :  { %v277_v25 = vmax.f32 %v276_v24, 0.0 }
  0x6a   :  { %v279_v26 = vmul.f32 %v277_v25, %v275_v23  ;;  %v278_v30 = vadd.f32 %v277_v25, %v275_v23 }
  0x6c   :  { %329 = vrsqrt.f32 %v279_v26  ;;  %vm282_vm3 = vcmp.eq.f32.partialorder %v279_v26, inf  ;;  %v285_v28 = vand.u32 2147483648, %v279_v26  ;;  %vm284_vm4 = vcmp.eq.f32.partialorder %v279_v26, 0.0 }
  0x76   :  { %v330_v27 = vpop.eup %329 }
  0x77   :  { %v281_v29 = vmul.f32 %v330_v27, %v279_v26 }
  0x79   :  { %v283_v31 = vsel %vm282_vm3, %v279_v26, %v281_v29 }
  0x7a   :  { %v286_v32 = vsel %vm284_vm4, %v285_v28, %v283_v31 }
  0x7b   :  { %v287_v33 = vmul.f32 2.0, %v286_v32 }
  0x7d   :  { %v288_v34 = vsub.f32 %v278_v30, %v287_v33 }
  0x7f   :  { %v290_v35 = vsel %vm50_vm1, %v288_v34, 0.0 }
  0x80   :  { %291 = vadd.xlane.f32.xlu0 %v290_v35 }
 0x10d   :  { %v292_v36 = vpop.xlane.xlu0 %291 }
 0x10e   :  { %v293_v37 = vrot.slane %v292_v36, 4 }
 0x110   :  { %v294_v39 = vadd.f32 %v293_v37, %v292_v36 }
 0x112   :  { %v295_v40 = vrot.slane %v294_v39, 2 }
 0x114   :  { %v296_v41 = vadd.f32 %v295_v40, %v294_v39 }
 0x116   :  { %v297_v42 = vrot.slane %v296_v41, 1 }
 0x118   :  { %v298_v38 = vadd.f32 %v297_v42, %v296_v41 }
 0x11a   :  { %321 = vpush %v298_v38 }
 0x14b   :  { %s322_s7 = spop %321 }
 0x14c   :  { %v300_v49 = vstv %s322_s7 }
 0x14d   :  { %v301_v50 = vadd.f32 %v300_v49, %v269_v46 }
 0x14f   :  { %302 = vst.msk [vmem:[#allocation13] sm:$0x1] %vm50_vm1, %v301_v50 }
 0x150   :  { %386 = shalt.err (!%p383_p6)
}
 0x151   :  { %s387_s12 = scalar_lea.hbm %s508_s2, 16 }
 0x152   :  { %p388_p7 = scmp.ne.s32.totalorder %s508_s2, %s387_s12  ;;  %p391_p8 = scmp.lt.u32.totalorder %s387_s12, %s508_s2 }
 0x154   :  { %p393_p9 = pnand %p391_p8, %p388_p7 }
 0x156   :  { %396 = shalt.err (!%p393_p9)
}
 0x157   :  { %312 = dma.vmem_to_hbm [thread:$0]  %s310_s6, 16, %s508_s2, [#allocation10]  }
 0x158   :  { %401 = dma.done.wait [#allocation10], 16  }
 0x159   :  { %402 = vsyncadd [#allocation10], 4294967280 }
 0x15a   :  { %316 = vsyncpa [#allocation9], 1 }
 0x15b   :  { %317 = vsyncpa [#allocation12], 1 }
 0x15c   :  { %318 = vsyncpa [#allocation10], 1 }

</bundles_post_ra>
